<compile_context>
chip_gen: v7x
topology: tpu7x:2x2x1
jax: 0.10.0
libtpu: 0.0.40
codegen_flags: <defaults>
</compile_context>

<pallas_src>
import functools

import jax
import jax.numpy as jnp
from jax.experimental import pallas as pl
from jax.experimental.pallas import tpu as pltpu

_NEG = -1e9
_BN_EPS = 1e-5
_BF16 = jnp.bfloat16
_VMEM = pl.BlockSpec(memory_space=pltpu.MemorySpace.VMEM)


def _round_up(x, m):
    return ((x + m - 1) // m) * m


def _vmem_limit_bytes():
    # Leave headroom under physical VMEM (64 MiB/TC on v7x, 128 MiB v5e/v6e).
    try:
        cap = int(pltpu.get_tpu_info().vmem_capacity_bytes)
    except Exception:
        cap = 64 * 2 ** 20
    return max(32 * 2 ** 20, min(cap - 8 * 2 ** 20, 100 * 2 ** 20))


def _leaky(x, slope=0.2):
    return jnp.where(x >= 0, x, slope * x)


# ----------------------------------------------------------------- kernels ---
def _embed_kernel(x_ref, w_ref, b_ref, o_ref):
    o_ref[...] = jnp.dot(x_ref[...].astype(_BF16), w_ref[...].astype(_BF16),
                         preferred_element_type=jnp.float32) + b_ref[...]


def _gat_prep_kernel(h_ref, w_ref, a_ref, feat_aug_ref, elt_ref, er_ref, *, H, D):
    """Per-layer fc + attention scores (small, grid-less)."""
    feat = jnp.dot(h_ref[...].astype(_BF16), w_ref[...].astype(_BF16),
                   preferred_element_type=jnp.float32)               # (N, H*D)
    # One MXU matmul yields every head's el (source term) and er (dest term).
    scores = jnp.dot(feat.astype(_BF16), a_ref[...].astype(_BF16),
                     preferred_element_type=jnp.float32)             # (N, 2H)
    elt_ref[...] = jnp.transpose(scores[:, :H])                      # (H, N)
    er_ref[...] = scores[:, H:]                                      # (N, H)
    # Source feature slab with a fused ones column per head: [F_h | 1] blocks
    # of width D+1, so p @ [F_h | 1] gives aggregation AND softmax row-sum.
    feat_bf = feat.astype(_BF16)
    ones = jnp.ones((feat.shape[0], 1), _BF16)
    parts = []
    for hd in range(H):
        parts.append(feat_bf[:, hd * D:(hd + 1) * D])
        parts.append(ones)
    feat_aug_ref[...] = jnp.concatenate(parts, axis=-1)              # (N, H*(D+1))


def _gat_attn_kernel(bias_ref, er_ref, elt_ref, feat_ref, h_ref, snorm_ref,
                     scale_ref, shift_ref, o_ref, *, H, D, residual):
    """One destination-row tile of one GAT layer (gridded, parallel)."""
    bias = bias_ref[...].astype(jnp.float32)                         # (T, N)
    # TODO(synk): on v6e/v7x the N^2 elementwise logit math could run in bf16
    # (VALU slot relief); kept f32 here for accuracy/portability (v5e VALU has
    # no bf16 path).
    heads = []
    for hd in range(H):
        logits = er_ref[:, hd:hd + 1] + elt_ref[hd:hd + 1, :]        # (T, N)
        e = _leaky(logits) + bias
        e = e - jnp.max(e, axis=-1, keepdims=True)                   # stable softmax
        p = jnp.exp(e).astype(_BF16)                                 # (T, N) bf16
        agg = jnp.dot(p, feat_ref[:, hd * (D + 1):(hd + 1) * (D + 1)],
                      preferred_element_type=jnp.float32)            # (T, D+1)
        # column D is the fused row-sum; deferred normalization via EUP recip.
        inv = pl.reciprocal(agg[:, D:D + 1], approx=True)
        heads.append(agg[:, :D] * inv)
    # single lane-dense store per tile (no per-head masked partial stores)
    rst = heads[0] if H == 1 else jnp.concatenate(heads, axis=-1)    # (T, C)
    rst = rst * snorm_ref[...]                                       # graph_norm
    rst = rst * scale_ref[...] + shift_ref[...]                      # folded BN (eval)
    rst = jnp.where(rst > 0, rst, jnp.exp(jnp.minimum(rst, 0.0)) - 1.0)   # ELU
    if residual:
        rst = h_ref[...] + rst
    o_ref[...] = rst


def _readout_kernel(seg_ref, h_ref, w0, b0, w1, b1, w2, b2, o_ref):
    hg = jnp.dot(seg_ref[...].astype(_BF16), h_ref[...].astype(_BF16),
                 preferred_element_type=jnp.float32)                 # mean_nodes
    y = jnp.maximum(jnp.dot(hg, w0[...], preferred_element_type=jnp.float32)
                    + b0[...], 0.0)
    y = jnp.maximum(jnp.dot(y, w1[...], preferred_element_type=jnp.float32)
                    + b1[...], 0.0)
    o_ref[...] = jnp.dot(y, w2[...], preferred_element_type=jnp.float32) + b2[...]


# ------------------------------------------------------------------ wrapper ---
def _build_attn_matrix(attn_l, attn_r):
    """(H, D) attn_l/attn_r -> block (H*D, 2H) so feat @ A yields all el/er."""
    H, D = attn_l.shape
    a = jnp.zeros((H * D, 2 * H), jnp.float32)
    for h in range(H):
        a = a.at[h * D:(h + 1) * D, h].set(attn_l[h])
        a = a.at[h * D:(h + 1) * D, H + h].set(attn_r[h])
    return a


def gat_net_forward(params, nodes_feat, adj, snorm_n, seg, cfg):
    L = cfg["L"]
    head_cfg = [(cfg["n_heads"], cfg["hidden_dim"]) if i < L - 1
                else (1, cfg["out_dim"]) for i in range(L)]
    N = nodes_feat.shape[0]
    G = seg.shape[0]
    ncls = cfg["n_classes"]

    # ---- padding / tiling over destination rows ----
    TILE = min(128, _round_up(N, 8))
    N_pad = _round_up(N, TILE)
    num_tiles = N_pad // TILE
    pad = N_pad - N

    x_p = jnp.pad(nodes_feat, ((0, pad), (0, 0)))
    # Precomputed additive edge-mask bias, bf16, padded rows/cols fully masked.
    bias = jnp.where(adj > 0, 0.0, _NEG).astype(_BF16)
    bias_p = jnp.full((N_pad, N_pad), _NEG, _BF16).at[:N, :N].set(bias)
    snorm_p = jnp.pad(snorm_n, ((0, pad), (0, 0)), constant_values=1.0)
    if not cfg.get("graph_norm", True):
        snorm_p = jnp.ones_like(snorm_p)
    seg_p = jnp.pad(seg, ((0, 0), (0, pad)))

    vmem_limit = _vmem_limit_bytes()
    small_params = pltpu.CompilerParams(vmem_limit_bytes=vmem_limit)
    attn_params = pltpu.CompilerParams(dimension_semantics=("parallel",),
                                       vmem_limit_bytes=vmem_limit)

    # ---- embedding (tiny, grid-less) ----
    HW = params["emb_w"].shape[1]
    h = pl.pallas_call(
        _embed_kernel,
        out_shape=jax.ShapeDtypeStruct((N_pad, HW), jnp.float32),
        in_specs=[_VMEM, _VMEM, _VMEM],
        out_specs=_VMEM,
        compiler_params=small_params,
    )(x_p, params["emb_w"], params["emb_b"])

    # ---- GAT layers ----
    for li, lp in enumerate(params["layers"]):
        H, D = head_cfg[li]
        C = H * D
        C_in = h.shape[1]
        a_cat = _build_attn_matrix(lp["attn_l"], lp["attn_r"])
        if cfg.get("batch_norm", True):
            scale = lp["gamma"] * jax.lax.rsqrt(lp["var"] + _BN_EPS)
            shift = lp["beta"] - lp["mean"] * scale
        else:
            scale = jnp.ones((1, C), jnp.float32)
            shift = jnp.zeros((1, C), jnp.float32)

        feat_aug, el_t, er = pl.pallas_call(
            functools.partial(_gat_prep_kernel, H=H, D=D),
            out_shape=(jax.ShapeDtypeStruct((N_pad, H * (D + 1)), _BF16),
                       jax.ShapeDtypeStruct((H, N_pad), jnp.float32),
                       jax.ShapeDtypeStruct((N_pad, H), jnp.float32)),
            in_specs=[_VMEM, _VMEM, _VMEM],
            out_specs=(_VMEM, _VMEM, _VMEM),
            compiler_params=small_params,
        )(h, lp["w"], a_cat)

        do_res = bool(cfg.get("residual", True)) and C_in == C
        flops = 2 * H * N_pad * N_pad * (D + 1) + 9 * H * N_pad * N_pad
        cost = pl.CostEstimate(
            flops=int(flops),
            transcendentals=int(H * N_pad * N_pad),
            bytes_accessed=int(2 * N_pad * N_pad + 2 * N_pad * H * (D + 1)
                               + 4 * N_pad * (C + C_in + 2 * H + 1)))

        h = pl.pallas_call(
            functools.partial(_gat_attn_kernel, H=H, D=D, residual=do_res),
            out_shape=jax.ShapeDtypeStruct((N_pad, C), jnp.float32),
            grid=(num_tiles,),
            in_specs=[
                pl.BlockSpec((TILE, N_pad), lambda i: (i, 0)),           # bias tile
                pl.BlockSpec((TILE, H), lambda i: (i, 0)),               # er (dst)
                pl.BlockSpec((H, N_pad), lambda i: (0, 0)),              # el (src)
                pl.BlockSpec((N_pad, H * (D + 1)), lambda i: (0, 0)),    # [F_h|1] slab
                pl.BlockSpec((TILE, C_in), lambda i: (i, 0)),            # h (residual)
                pl.BlockSpec((TILE, 1), lambda i: (i, 0)),               # snorm
                pl.BlockSpec((1, C), lambda i: (0, 0)),                  # BN scale
                pl.BlockSpec((1, C), lambda i: (0, 0)),                  # BN shift
            ],
            out_specs=pl.BlockSpec((TILE, C), lambda i: (i, 0)),
            compiler_params=attn_params,
            cost_estimate=cost,
        )(bias_p, er, el_t, feat_aug, h, snorm_p, scale, shift)

    # ---- mean readout + MLP head (tiny, grid-less) ----
    ro = params["readout"]
    return pl.pallas_call(
        _readout_kernel,
        out_shape=jax.ShapeDtypeStruct((G, ncls), jnp.float32),
        in_specs=[_VMEM] * 8,
        out_specs=_VMEM,
        compiler_params=small_params,
    )(seg_p, h, ro["w0"], ro["b0"], ro["w1"], ro["b1"], ro["w2"], ro["b2"])


# --------------------------------------------------------------- parameters ---
def init_params(key, cfg):
    in_dim, hd, nh = cfg["in_dim"], cfg["hidden_dim"], cfg["n_heads"]
    out_dim, ncls, L = cfg["out_dim"], cfg["n_classes"], cfg["L"]
    hw = hd * nh

    def nrm(k, shape, scale=0.1):
        return (scale * jax.random.normal(k, shape)).astype(jnp.float32)

    keys = iter(jax.random.split(key, 64))
    params = {
        "emb_w": nrm(next(keys), (in_dim, hw)),
        "emb_b": nrm(next(keys), (1, hw)),
        "layers": [],
    }
    for i in range(L):
        H = nh if i < L - 1 else 1
        D = hd if i < L - 1 else out_dim
        C = H * D
        params["layers"].append({
            "w": nrm(next(keys), (hw, C)),
            "attn_l": nrm(next(keys), (H, D)),
            "attn_r": nrm(next(keys), (H, D)),
            # BatchNorm1d running stats / affine (eval mode)
            "gamma": 1.0 + nrm(next(keys), (1, C), 0.05),
            "beta": nrm(next(keys), (1, C), 0.05),
            "mean": nrm(next(keys), (1, C), 0.05),
            "var": 1.0 + jnp.abs(nrm(next(keys), (1, C), 0.05)),
        })
    # MLPReadout: out_dim -> out_dim//2 -> out_dim//4 -> n_classes
    d0, d1, d2 = out_dim, out_dim // 2, out_dim // 4
    params["readout"] = {
        "w0": nrm(next(keys), (d0, d1)), "b0": nrm(next(keys), (1, d1)),
        "w1": nrm(next(keys), (d1, d2)), "b1": nrm(next(keys), (1, d2)),
        "w2": nrm(next(keys), (d2, ncls)), "b2": nrm(next(keys), (1, ncls)),
    }
    return params


if __name__ == "__main__":
    cfg = dict(in_dim=4, hidden_dim=8, n_heads=4, out_dim=32, n_classes=7,
               L=3, readout="mean", graph_norm=True, batch_norm=True,
               residual=True)

    G, n_per_graph = 2, 80               # 2 graphs x 80 nodes -> exercises 2 dst tiles
    N = G * n_per_graph

    key = jax.random.PRNGKey(0)
    k_param, k_feat = jax.random.split(key)
    params = init_params(k_param, cfg)

    nodes_feat = jax.random.normal(k_feat, (N, cfg["in_dim"])).astype(jnp.float32)
    # TODO(synk): edges_feat is not consumed by GATNet's forward (GATConv ignores it)
    edges_feat = None

    # block-diagonal ring adjacency with self-loops (edge src j -> dst i)
    idx = jnp.arange(n_per_graph)
    diff = (idx[:, None] - idx[None, :]) % n_per_graph
    ring = ((diff == 0) | (diff == 1) | (diff == n_per_graph - 1)).astype(jnp.float32)
    adj = jnp.zeros((N, N), jnp.float32)
    for gi in range(G):
        s = gi * n_per_graph
        adj = adj.at[s:s + n_per_graph, s:s + n_per_graph].set(ring)

    # nodes_num_norm_sqrt: 1/sqrt(|V_g|) per node
    snorm_n = jnp.full((N, 1), 1.0 / jnp.sqrt(float(n_per_graph)), jnp.float32)

    # mean-readout segment matrix (G, N)
    seg = jnp.zeros((G, N), jnp.float32)
    for gi in range(G):
        s = gi * n_per_graph
        seg = seg.at[gi, s:s + n_per_graph].set(1.0 / n_per_graph)

    logits = gat_net_forward(params, nodes_feat, adj, snorm_n, seg, cfg)
    logits = jax.block_until_ready(logits)
    assert logits.shape == (G, cfg["n_classes"])
    assert bool(jnp.all(jnp.isfinite(logits)))
    print("KERNEL_OK")
</pallas_src>

<mosaic_0001>
module attributes {stable_mosaic.version = 11 : i64} {
  func.func @_embed_kernel(%arg0: memref<256x4xf32, #tpu.memory_space<vmem>>, %arg1: memref<4x32xf32, #tpu.memory_space<vmem>>, %arg2: memref<1x32xf32, #tpu.memory_space<vmem>>, %arg3: memref<256x32xf32, #tpu.memory_space<vmem>>) attributes {dimension_semantics = [], scalar_prefetch = 0 : i64, scratch_operands = 0 : i64, tpu.core_type = #tpu.core_type<tc>} {
    %c0 = arith.constant 0 : index
    %c0_0 = arith.constant 0 : index
    %0 = vector.load %arg0[%c0, %c0_0] : memref<256x4xf32, #tpu.memory_space<vmem>>, vector<256x4xf32>
    %1 = arith.truncf %0 : vector<256x4xf32> to vector<256x4xbf16>
    %c0_1 = arith.constant 0 : index
    %c0_2 = arith.constant 0 : index
    %2 = vector.load %arg1[%c0_1, %c0_2] : memref<4x32xf32, #tpu.memory_space<vmem>>, vector<4x32xf32>
    %3 = arith.truncf %2 : vector<4x32xf32> to vector<4x32xbf16>
    %cst = arith.constant dense<0.000000e+00> : vector<256x32xf32>
    %4 = tpu.matmul %1, %3, %cst {dimension_numbers = #tpu.dot_dimension_numbers<[1], [0], [0], [1], [0, 0, 1, 1], [], []>} : vector<256x4xbf16>, vector<4x32xbf16>, vector<256x32xf32> -> vector<256x32xf32>
    %c0_3 = arith.constant 0 : index
    %c0_4 = arith.constant 0 : index
    %5 = vector.load %arg2[%c0_3, %c0_4] : memref<1x32xf32, #tpu.memory_space<vmem>>, vector<1x32xf32>
    %6 = vector.broadcast %5 : vector<1x32xf32> to vector<256x32xf32>
    %7 = arith.addf %4, %6 : vector<256x32xf32>
    %c0_5 = arith.constant 0 : index
    %c0_6 = arith.constant 0 : index
    %8 = vector.load %arg3[%c0_5, %c0_6] : memref<256x32xf32, #tpu.memory_space<vmem>>, vector<256x32xf32>
    tpu.vector_store %arg3[%c0_5, %c0_6], %7 {strides = array<i32>} : memref<256x32xf32, #tpu.memory_space<vmem>>, vector<256x32xf32>,
    return
  }
}

</mosaic_0001>

<bundles_post_ra>
// kernel: tpu_custom_call.1
= control target key start
LH: loop header
LB: loop body
LE: loop exit
PB: predicated region body
PF: predicated region fallthrough
CT: control target
= control target key end

     0   :  { %vm121_vm0 = vcmask 1041408   ;;  %vm72_vm1 = vcmask 31744   ;;  %vm286_vm2 = vcmask 261120   ;;  %s695_s1 = inlined_call_operand.vmem [shape: f32[4,32], index: 1, kind: input, shape index: {}]   ;;  %s696_s0 = inlined_call_operand.vmem [shape: f32[256,4], index: 0, kind: input, shape index: {}]   ;;  %s697_s2 = inlined_call_operand.vmem [shape: f32[1,32], index: 2, kind: input, shape index: {}]   ;;  %s698_s3 = inlined_call_operand.vmem [shape: f32[256,32], index: 3, kind: output, shape index: {}]  }
   0x1   :  { %v63_v0 = vld [vmem:[%s695_s1] sm:$0xf]  ;;  %v16_v2 = vld [vmem:[%s696_s0 + $0x8] sm:$0xff]  ;;  %v17_v7 = vld [vmem:[%s696_s0 + $0x10] sm:$0xff] }
   0x2   :  { %v15_v1 = vld [vmem:[%s696_s0] sm:$0xff]  ;;  %v64_v3 = vpack.c.bf16 %v63_v0, %v63_v0  ;;  %v32_v6 = vld [vmem:[%s696_s0 + $0x88] sm:$0xff]  ;;  %v18_v9 = vld [vmem:[%s696_s0 + $0x18] sm:$0xff] }
   0x3   :  { %v47_v4 = vpack.c.bf16 %v16_v2, %v15_v1  ;;  %v31_v5 = vld [vmem:[%s696_s0 + $0x80] sm:$0xff]  ;;  %v33_v10 = vld [vmem:[%s696_s0 + $0x90] sm:$0xff]  ;;  %v34_v11 = vld [vmem:[%s696_s0 + $0x98] sm:$0xff]  ;;  %v48_v13 = vpack.c.bf16 %v18_v9, %v17_v7 }
   0x4   :  { %v55_v8 = vpack.c.bf16 %v32_v6, %v31_v5  ;;  %393 = vmatprep.subr.msk.bf16.mxu0 %vm121_vm0, %v64_v3  ;;  %394 = vmatprep.subr.msk.bf16.mxu1 %vm121_vm0, %v64_v3  ;;  %v123_v12 = vsel %vm121_vm0, %v64_v3, 0  ;;  %v56_v14 = vpack.c.bf16 %v34_v11, %v33_v10  ;;  %v19_v15 = vld [vmem:[%s696_s0 + $0x20] sm:$0xff]  ;;  %v20_v16 = vld [vmem:[%s696_s0 + $0x28] sm:$0xff]  ;;  %v21_v21 = vld [vmem:[%s696_s0 + $0x30] sm:$0xff] }
   0x5   :  { %v35_v17 = vld [vmem:[%s696_s0 + $0xa0] sm:$0xff]  ;;  %358 = vmatpush3.bf16.msra.mxu0 %v123_v12  ;;  %392 = vmatpush3.bf16.msra.mxu1 %v123_v12  ;;  %v49_v18 = vpack.c.bf16 %v20_v16, %v19_v15  ;;  %v36_v19 = vld [vmem:[%s696_s0 + $0xa8] sm:$0xff]  ;;  %v22_v22 = vld [vmem:[%s696_s0 + $0x38] sm:$0xff] }
   0x6   :  { %359 = vmatprep.mubr.msk.bf16.mxu0 %vm72_vm1, %v47_v4  ;;  %375 = vmatprep.mubr.msk.bf16.mxu1 %vm72_vm1, %v55_v8  ;;  %v57_v20 = vpack.c.bf16 %v36_v19, %v35_v17  ;;  %v37_v23 = vld [vmem:[%s696_s0 + $0xb0] sm:$0xff]  ;;  %v38_v24 = vld [vmem:[%s696_s0 + $0xb8] sm:$0xff]  ;;  %v23_v25 = vld [vmem:[%s696_s0 + $0x40] sm:$0xff]  ;;  %v50_v29 = vpack.c.bf16 %v22_v22, %v21_v21 }
   0x7   :  { %v24_v26 = vld [vmem:[%s696_s0 + $0x48] sm:$0xff]  ;;  %v39_v27 = vld [vmem:[%s696_s0 + $0xc0] sm:$0xff]  ;;  %v58_v30 = vpack.c.bf16 %v38_v24, %v37_v23  ;;  %v25_v33 = vld [vmem:[%s696_s0 + $0x50] sm:$0xff] }
   0x8   :  { %360 = vmatmul.mubr.msk.bf16.vlgmr.msra.gmra.mrb[0].mxu0 %vm72_vm1, %v48_v13  ;;  %376 = vmatmul.mubr.msk.bf16.vlgmr.msra.gmra.mrb[0].mxu1 %vm72_vm1, %v56_v14  ;;  %v40_v28 = vld [vmem:[%s696_s0 + $0xc8] sm:$0xff]  ;;  %v51_v31 = vpack.c.bf16 %v24_v26, %v23_v25  ;;  %v26_v34 = vld [vmem:[%s696_s0 + $0x58] sm:$0xff]  ;;  %v41_v35 = vld [vmem:[%s696_s0 + $0xd0] sm:$0xff] }
   0x9   :  { %363 = vmatprep.mubr.msk.bf16.mxu0 %vm72_vm1, %v49_v18  ;;  %379 = vmatprep.mubr.msk.bf16.mxu1 %vm72_vm1, %v57_v20  ;;  %v59_v32 = vpack.c.bf16 %v40_v28, %v39_v27  ;;  %v42_v36 = vld [vmem:[%s696_s0 + $0xd8] sm:$0xff]  ;;  %v27_v37 = vld [vmem:[%s696_s0 + $0x60] sm:$0xff]  ;;  %v28_v38 = vld [vmem:[%s696_s0 + $0x68] sm:$0xff]  ;;  %v52_v41 = vpack.c.bf16 %v26_v34, %v25_v33 }
   0xa   :  { %v43_v39 = vld [vmem:[%s696_s0 + $0xe0] sm:$0xff]  ;;  %v44_v40 = vld [vmem:[%s696_s0 + $0xe8] sm:$0xff]  ;;  %v60_v42 = vpack.c.bf16 %v42_v36, %v41_v35  ;;  %v53_v43 = vpack.c.bf16 %v28_v38, %v27_v37  ;;  %v29_v45 = vld [vmem:[%s696_s0 + $0x70] sm:$0xff] }
   0xb   :  { %v61_v44 = vpack.c.bf16 %v44_v40, %v43_v39  ;;  %v30_v46 = vld [vmem:[%s696_s0 + $0x78] sm:$0xff]  ;;  %v45_v47 = vld [vmem:[%s696_s0 + $0xf0] sm:$0xff]  ;;  %v533_v51 = vld [vmem:[%s697_s2] ss:$0 sm:$0xff] }
   0xc   :  { %v46_v48 = vld [vmem:[%s696_s0 + $0xf8] sm:$0xff]  ;;  %v54_v49 = vpack.c.bf16 %v30_v46, %v29_v45 }
   0xd   :  { %v62_v50 = vpack.c.bf16 %v46_v48, %v45_v47 }
  0x10   :  { %364 = vmatmul.mubr.msk.bf16.gmra.mrb[4].mxu0 %vm72_vm1, %v50_v29  ;;  %380 = vmatmul.mubr.msk.bf16.gmra.mrb[4].mxu1 %vm72_vm1, %v58_v30 }
  0x11   :  { %367 = vmatprep.mubr.msk.bf16.mxu0 %vm72_vm1, %v51_v31  ;;  %383 = vmatprep.mubr.msk.bf16.mxu1 %vm72_vm1, %v59_v32 }
  0x18   :  { %368 = vmatmul.mubr.msk.bf16.gmra.mrb[8].mxu0 %vm72_vm1, %v52_v41  ;;  %384 = vmatmul.mubr.msk.bf16.gmra.mrb[8].mxu1 %vm72_vm1, %v60_v42 }
  0x19   :  { %371 = vmatprep.mubr.msk.bf16.mxu0 %vm72_vm1, %v53_v43  ;;  %387 = vmatprep.mubr.msk.bf16.mxu1 %vm72_vm1, %v61_v44 }
  0x20   :  { %372 = vmatmul.mubr.msk.bf16.gmra.mrb[12].mxu0 %vm72_vm1, %v54_v49  ;;  %388 = vmatmul.mubr.msk.bf16.gmra.mrb[12].mxu1 %vm72_vm1, %v62_v50 }
  0xdb   :  { %v361_v52 = vpop.f32.mrb[0].mxu0  ;;  %v377_v53 = vpop.f32.mrb[0].mxu1 }
  0xdc   :  { %v168_v54 = vadd.f32 %v361_v52, %v533_v51  ;;  %v232_v55 = vadd.f32 %v377_v53, %v533_v51  ;;  %v159_v56 = vpop.f32.mrb[1].mxu0  ;;  %v223_v57 = vpop.f32.mrb[1].mxu1 }
  0xdd   :  { %v160_v58 = vadd.f32 %v533_v51, %v159_v56  ;;  %v224_v59 = vadd.f32 %v533_v51, %v223_v57  ;;  %v362_v60 = vpop.f32.mrb[2].mxu0  ;;  %v378_v61 = vpop.f32.mrb[2].mxu1 }
  0xde   :  { %289 = vst.msk [vmem:[%s698_s3 + $0x10] sm:$0xff] %vm286_vm2, %v168_v54  ;;  %305 = vst.msk [vmem:[%s698_s3 + $0x90] sm:$0xff] %vm286_vm2, %v232_v55  ;;  %v171_v62 = vadd.f32 %v362_v60, %v533_v51  ;;  %v235_v63 = vadd.f32 %v378_v61, %v533_v51  ;;  %v162_v0 = vpop.f32.mrb[3].mxu0  ;;  %v226_v1 = vpop.f32.mrb[3].mxu1 }
  0xdf   :  { %287 = vst.msk [vmem:[%s698_s3] sm:$0xff] %vm286_vm2, %v160_v58  ;;  %303 = vst.msk [vmem:[%s698_s3 + $0x80] sm:$0xff] %vm286_vm2, %v224_v59  ;;  %v163_v2 = vadd.f32 %v533_v51, %v162_v0  ;;  %v227_v3 = vadd.f32 %v533_v51, %v226_v1 }
  0xe0   :  { %290 = vst.msk [vmem:[%s698_s3 + $0x18] sm:$0xff] %vm286_vm2, %v171_v62  ;;  %306 = vst.msk [vmem:[%s698_s3 + $0x98] sm:$0xff] %vm286_vm2, %v235_v63 }
  0xe1   :  { %288 = vst.msk [vmem:[%s698_s3 + $0x8] sm:$0xff] %vm286_vm2, %v163_v2  ;;  %304 = vst.msk [vmem:[%s698_s3 + $0x88] sm:$0xff] %vm286_vm2, %v227_v3 }
  0xe3   :  { %v365_v4 = vpop.f32.mrb[4].mxu0  ;;  %v381_v5 = vpop.f32.mrb[4].mxu1 }
  0xe4   :  { %v184_v6 = vadd.f32 %v365_v4, %v533_v51  ;;  %v248_v7 = vadd.f32 %v381_v5, %v533_v51  ;;  %v175_v8 = vpop.f32.mrb[5].mxu0  ;;  %v239_v9 = vpop.f32.mrb[5].mxu1 }
  0xe5   :  { %v176_v10 = vadd.f32 %v533_v51, %v175_v8  ;;  %v240_v11 = vadd.f32 %v533_v51, %v239_v9  ;;  %v366_v12 = vpop.f32.mrb[6].mxu0  ;;  %v382_v13 = vpop.f32.mrb[6].mxu1 }
  0xe6   :  { %293 = vst.msk [vmem:[%s698_s3 + $0x30] sm:$0xff] %vm286_vm2, %v184_v6  ;;  %309 = vst.msk [vmem:[%s698_s3 + $0xb0] sm:$0xff] %vm286_vm2, %v248_v7  ;;  %v187_v14 = vadd.f32 %v366_v12, %v533_v51  ;;  %v251_v15 = vadd.f32 %v382_v13, %v533_v51  ;;  %v178_v16 = vpop.f32.mrb[7].mxu0  ;;  %v242_v17 = vpop.f32.mrb[7].mxu1 }
  0xe7   :  { %291 = vst.msk [vmem:[%s698_s3 + $0x20] sm:$0xff] %vm286_vm2, %v176_v10  ;;  %307 = vst.msk [vmem:[%s698_s3 + $0xa0] sm:$0xff] %vm286_vm2, %v240_v11  ;;  %v179_v18 = vadd.f32 %v533_v51, %v178_v16  ;;  %v243_v19 = vadd.f32 %v533_v51, %v242_v17 }
  0xe8   :  { %294 = vst.msk [vmem:[%s698_s3 + $0x38] sm:$0xff] %vm286_vm2, %v187_v14  ;;  %310 = vst.msk [vmem:[%s698_s3 + $0xb8] sm:$0xff] %vm286_vm2, %v251_v15 }
  0xe9   :  { %292 = vst.msk [vmem:[%s698_s3 + $0x28] sm:$0xff] %vm286_vm2, %v179_v18  ;;  %308 = vst.msk [vmem:[%s698_s3 + $0xa8] sm:$0xff] %vm286_vm2, %v243_v19 }
  0xeb   :  { %v369_v20 = vpop.f32.mrb[8].mxu0  ;;  %v385_v21 = vpop.f32.mrb[8].mxu1 }
  0xec   :  { %v200_v22 = vadd.f32 %v369_v20, %v533_v51  ;;  %v264_v23 = vadd.f32 %v385_v21, %v533_v51  ;;  %v191_v24 = vpop.f32.mrb[9].mxu0  ;;  %v255_v25 = vpop.f32.mrb[9].mxu1 }
  0xed   :  { %v192_v26 = vadd.f32 %v533_v51, %v191_v24  ;;  %v256_v27 = vadd.f32 %v533_v51, %v255_v25  ;;  %v370_v28 = vpop.f32.mrb[10].mxu0  ;;  %v386_v29 = vpop.f32.mrb[10].mxu1 }
  0xee   :  { %297 = vst.msk [vmem:[%s698_s3 + $0x50] sm:$0xff] %vm286_vm2, %v200_v22  ;;  %313 = vst.msk [vmem:[%s698_s3 + $0xd0] sm:$0xff] %vm286_vm2, %v264_v23  ;;  %v203_v30 = vadd.f32 %v370_v28, %v533_v51  ;;  %v267_v31 = vadd.f32 %v386_v29, %v533_v51  ;;  %v194_v32 = vpop.f32.mrb[11].mxu0  ;;  %v258_v33 = vpop.f32.mrb[11].mxu1 }
  0xef   :  { %295 = vst.msk [vmem:[%s698_s3 + $0x40] sm:$0xff] %vm286_vm2, %v192_v26  ;;  %311 = vst.msk [vmem:[%s698_s3 + $0xc0] sm:$0xff] %vm286_vm2, %v256_v27  ;;  %v195_v34 = vadd.f32 %v533_v51, %v194_v32  ;;  %v259_v35 = vadd.f32 %v533_v51, %v258_v33 }
  0xf0   :  { %298 = vst.msk [vmem:[%s698_s3 + $0x58] sm:$0xff] %vm286_vm2, %v203_v30  ;;  %314 = vst.msk [vmem:[%s698_s3 + $0xd8] sm:$0xff] %vm286_vm2, %v267_v31 }
  0xf1   :  { %296 = vst.msk [vmem:[%s698_s3 + $0x48] sm:$0xff] %vm286_vm2, %v195_v34  ;;  %312 = vst.msk [vmem:[%s698_s3 + $0xc8] sm:$0xff] %vm286_vm2, %v259_v35 }
  0xf3   :  { %v373_v36 = vpop.f32.mrb[12].mxu0  ;;  %v389_v37 = vpop.f32.mrb[12].mxu1 }
  0xf4   :  { %v216_v38 = vadd.f32 %v373_v36, %v533_v51  ;;  %v280_v39 = vadd.f32 %v389_v37, %v533_v51  ;;  %v207_v40 = vpop.f32.mrb[13].mxu0  ;;  %v271_v41 = vpop.f32.mrb[13].mxu1 }
  0xf5   :  { %v208_v42 = vadd.f32 %v533_v51, %v207_v40  ;;  %v272_v43 = vadd.f32 %v533_v51, %v271_v41  ;;  %v374_v44 = vpop.f32.mrb[14].mxu0  ;;  %v390_v45 = vpop.f32.mrb[14].mxu1 }
  0xf6   :  { %301 = vst.msk [vmem:[%s698_s3 + $0x70] sm:$0xff] %vm286_vm2, %v216_v38  ;;  %317 = vst.msk [vmem:[%s698_s3 + $0xf0] sm:$0xff] %vm286_vm2, %v280_v39  ;;  %v219_v46 = vadd.f32 %v374_v44, %v533_v51  ;;  %v283_v47 = vadd.f32 %v390_v45, %v533_v51  ;;  %v210_v48 = vpop.f32.mrb[15].mxu0  ;;  %v274_v49 = vpop.f32.mrb[15].mxu1 }
  0xf7   :  { %299 = vst.msk [vmem:[%s698_s3 + $0x60] sm:$0xff] %vm286_vm2, %v208_v42  ;;  %315 = vst.msk [vmem:[%s698_s3 + $0xe0] sm:$0xff] %vm286_vm2, %v272_v43  ;;  %v211_v50 = vadd.f32 %v533_v51, %v210_v48  ;;  %v275_v52 = vadd.f32 %v533_v51, %v274_v49 }
  0xf8   :  { %302 = vst.msk [vmem:[%s698_s3 + $0x78] sm:$0xff] %vm286_vm2, %v219_v46  ;;  %318 = vst.msk [vmem:[%s698_s3 + $0xf8] sm:$0xff] %vm286_vm2, %v283_v47 }
  0xf9   :  { %300 = vst.msk [vmem:[%s698_s3 + $0x68] sm:$0xff] %vm286_vm2, %v211_v50  ;;  %316 = vst.msk [vmem:[%s698_s3 + $0xe8] sm:$0xff] %vm286_vm2, %v275_v52 }

</bundles_post_ra>
